<compile_context>
chip_gen: v7x
topology: tpu7x:2x2x1
jax: 0.10.0
libtpu: 0.0.40
codegen_flags: <defaults>
</compile_context>

<pallas_src>
import functools

import jax
import jax.numpy as jnp
from jax.experimental import pallas as pl
from jax.experimental.pallas import tpu as pltpu


_VMEM_LIMIT_BYTES = 48 * 1024 * 1024   # raise scoped VMEM above 16/32 MiB defaults, < v7x 64 MiB
_TILE_BUDGET_BYTES = 16 * 1024 * 1024  # budget for double-buffered tiles + temporaries


def _choose_tile_rows(R0, C):
    """Largest tile height (multiple of 8, capped at 512) that fits the VMEM budget."""
    # per tile row: 2x double-buffered (pred C rows + tgt + prob + ce) + ~3C rows of
    # elementwise temporaries inside the kernel (one-hot, shifted logits, exp).
    per_row = 128 * 4 * (2 * (C + 3) + 3 * C)
    cap = max(8, _TILE_BUDGET_BYTES // per_row)
    tr = int(min(cap, 512))
    tr = max(8, (tr // 8) * 8)
    r0_up8 = ((R0 + 7) // 8) * 8
    return min(tr, r0_up8)


def _choose_reduce_rows(TR, BR):
    """Larger tile for the reduction pass (only 3 lane-wide arrays are streamed)."""
    tr2 = TR
    cap = min(BR, 2048)
    while tr2 * 2 <= cap and BR % (tr2 * 2) == 0:
        tr2 *= 2
    return tr2


# --------------------------------------------------------------------------
# Kernel 1: per-pixel softmax / cross-entropy / target-class probability
# --------------------------------------------------------------------------
def _perpixel_kernel(pred_ref, tgt_ref, prob_ref, ce_ref, *, ignore_index):
    # pred_ref: (C, TR, 128) ; tgt_ref: (TR, 128) i32  (batch dim squeezed away)
    pred = pred_ref[...].astype(jnp.float32)
    tgt = tgt_ref[...]

    valid = tgt != ignore_index
    tgt_c = jnp.where(valid, tgt, 0)                        # torch: target * valid_mask

    cls = jax.lax.broadcasted_iota(jnp.int32, pred.shape, 0)
    onehot = (cls == tgt_c[None, :, :]).astype(jnp.float32)

    m = jnp.max(pred, axis=0)                               # (TR, 128) reduce over classes
    z = pred - m[None, :, :]
    lse = jnp.log(jnp.sum(jnp.exp(z), axis=0))              # (TR, 128)
    t_logit = jnp.sum(z * onehot, axis=0)                   # (TR, 128) = logit[target] - m

    logp_t = t_logit - lse
    ce_ref[...] = -logp_t
    prob_ref[...] = jnp.where(valid, jnp.exp(logp_t), 1.0)  # torch: masked_fill_(~valid, 1)


# --------------------------------------------------------------------------
# Kernel 2: OHEM kept-mask + masked reductions (vector accumulator, scalar store last)
# --------------------------------------------------------------------------
def _reduce_kernel(thresh_ref, tgt_ref, ce_ref, prob_ref,
                   sk_ref, ck_ref, sv_ref, cv_ref, acc_ref, *, ignore_index):
    step = pl.program_id(0)

    @pl.when(step == 0)
    def _():
        acc_ref[...] = jnp.zeros_like(acc_ref)

    threshold = thresh_ref[0, 0]
    tgt = tgt_ref[...]
    ce = ce_ref[...]
    prob = prob_ref[...]

    valid = (tgt != ignore_index).astype(jnp.float32)
    kept = valid * (prob <= threshold).astype(jnp.float32)

    def fold(x):  # (TR2,128) -> (8,128) via VPU vreg adds (cross-lane reduce deferred)
        return jnp.sum(x.reshape(-1, 8, 128), axis=0)

    acc_ref[0] += fold(ce * kept)
    acc_ref[1] += fold(kept)
    acc_ref[2] += fold(ce * valid)
    acc_ref[3] += fold(valid)

    @pl.when(step == pl.num_programs(0) - 1)
    def _():
        sk_ref[...] = jnp.sum(acc_ref[0], keepdims=True)
        ck_ref[...] = jnp.sum(acc_ref[1], keepdims=True)
        sv_ref[...] = jnp.sum(acc_ref[2], keepdims=True)
        cv_ref[...] = jnp.sum(acc_ref[3], keepdims=True)


# --------------------------------------------------------------------------
# OhemCrossEntropy2dTensor.forward equivalent
# --------------------------------------------------------------------------
def ohem_ce_loss(pred, target, *, thresh=0.7, min_kept=256, ignore_index=255):
    B, C, H, W = pred.shape
    HW = H * W

    # Row/lane layout: pad H*W once up to a multiple of TR*128 (padded pixels are ignored).
    R0 = -(-HW // 128)
    TR = _choose_tile_rows(R0, C)
    R = -(-R0 // TR) * TR
    HWp = R * 128

    pred_flat = pred.reshape(B, C, HW)
    tgt_flat = target.reshape(B, HW).astype(jnp.int32)
    if HWp != HW:
        pred_flat = jnp.pad(pred_flat, ((0, 0), (0, 0), (0, HWp - HW)), constant_values=0.0)
        tgt_flat = jnp.pad(tgt_flat, ((0, 0), (0, HWp - HW)), constant_values=ignore_index)
    pred_r = pred_flat.reshape(B, C, R, 128)                 # free row-major reshape
    tgt_r = tgt_flat.reshape(B, R, 128)

    grid1 = (B, R // TR)
    kernel1 = functools.partial(_perpixel_kernel, ignore_index=ignore_index)
    prob_t, ce = pl.pallas_call(
        kernel1,
        out_shape=(
            jax.ShapeDtypeStruct((B, R, 128), jnp.float32),
            jax.ShapeDtypeStruct((B, R, 128), jnp.float32),
        ),
        grid=grid1,
        in_specs=[
            pl.BlockSpec((None, C, TR, 128), lambda b, i: (b, 0, i, 0)),
            pl.BlockSpec((None, TR, 128), lambda b, i: (b, i, 0)),
        ],
        out_specs=(
            pl.BlockSpec((None, TR, 128), lambda b, i: (b, i, 0)),
            pl.BlockSpec((None, TR, 128), lambda b, i: (b, i, 0)),
        ),
        compiler_params=pltpu.CompilerParams(
            dimension_semantics=("parallel", "parallel"),
            vmem_limit_bytes=_VMEM_LIMIT_BYTES,
        ),
    )(pred_r, tgt_r)

    # OHEM threshold selection (torch: sort + threshold_index) via exact k-th smallest.
    # Padded/invalid pixels carry prob=1.0 (the maximum) so they never change the result.
    # TODO(synk): replace with an O(N) bucket/histogram select over prob in [0,1].
    if min_kept > 0:
        k = min(B * HW, int(min_kept))
        neg_topk, _ = jax.lax.top_k(-prob_t.reshape(-1), k)
        kth = -neg_topk[k - 1]
        threshold = jnp.maximum(jnp.float32(thresh), kth)
    else:
        threshold = jnp.float32(thresh)
    thresh_arr = threshold.reshape(1, 1).astype(jnp.float32)

    BR = B * R
    TR2 = _choose_reduce_rows(TR, BR)                        # TR | R  =>  TR2 | B*R
    grid2 = (BR // TR2,)
    kernel2 = functools.partial(_reduce_kernel, ignore_index=ignore_index)
    sum_kept, cnt_kept, sum_valid, cnt_valid = pl.pallas_call(
        kernel2,
        out_shape=tuple(jax.ShapeDtypeStruct((1, 1), jnp.float32) for _ in range(4)),
        grid=grid2,
        in_specs=[
            pl.BlockSpec(memory_space=pltpu.MemorySpace.SMEM),
            pl.BlockSpec((TR2, 128), lambda i: (i, 0)),
            pl.BlockSpec((TR2, 128), lambda i: (i, 0)),
            pl.BlockSpec((TR2, 128), lambda i: (i, 0)),
        ],
        out_specs=tuple(pl.BlockSpec((1, 1), lambda i: (0, 0)) for _ in range(4)),
        scratch_shapes=[pltpu.VMEM((4, 8, 128), jnp.float32)],
        compiler_params=pltpu.CompilerParams(
            dimension_semantics=("arbitrary",),
            vmem_limit_bytes=_VMEM_LIMIT_BYTES,
        ),
    )(thresh_arr,
      tgt_r.reshape(BR, 128),
      ce.reshape(BR, 128),
      prob_t.reshape(BR, 128))

    num_valid = cnt_valid[0, 0]
    use_ohem = (num_valid > 0) & (num_valid >= jnp.float32(min_kept))
    # NB: if every pixel is ignored (cnt_valid == 0) this is NaN, matching torch's
    # CrossEntropyLoss(reduction='mean') with all targets == ignore_index.
    return jnp.where(use_ohem,
                     sum_kept[0, 0] / cnt_kept[0, 0],
                     sum_valid[0, 0] / cnt_valid[0, 0])


# --------------------------------------------------------------------------
# CriterionOhem.forward equivalent
# --------------------------------------------------------------------------
def criterion_ohem(preds, target, *, aux_weight, thresh=0.7, min_kept=100000, ignore_index=255):
    h, w = target.shape[1], target.shape[2]
    if aux_weight > 0:
        main_pred, aux_pred = preds
        assert main_pred.shape[2:] == aux_pred.shape[2:] == (h, w)
        loss1 = ohem_ce_loss(main_pred, target, thresh=thresh, min_kept=min_kept,
                             ignore_index=ignore_index)
        loss2 = ohem_ce_loss(aux_pred, target, thresh=thresh, min_kept=min_kept,
                             ignore_index=ignore_index)
        return loss1 + aux_weight * loss2
    else:
        assert preds.shape[2:] == (h, w)
        return ohem_ce_loss(preds, target, thresh=thresh, min_kept=min_kept,
                            ignore_index=ignore_index)


# --------------------------------------------------------------------------
# Pure-JAX reference (mirrors the PyTorch math) for a correctness check
# --------------------------------------------------------------------------
def _ohem_ce_loss_ref(pred, target, *, thresh, min_kept, ignore_index):
    B, C, H, W = pred.shape
    tgt = target.reshape(-1)
    valid = tgt != ignore_index
    tgt_c = jnp.where(valid, tgt, 0)
    logits = jnp.transpose(pred, (1, 0, 2, 3)).reshape(C, -1).T           # (N, C)
    logp = jax.nn.log_softmax(logits.astype(jnp.float32), axis=-1)
    ce = -jnp.take_along_axis(logp, tgt_c[:, None], axis=-1)[:, 0]
    prob_t = jnp.where(valid, jnp.exp(-ce), 1.0)
    num_valid = jnp.sum(valid)
    if min_kept > 0:
        k = min(tgt.shape[0], int(min_kept))
        kth = jnp.sort(prob_t)[k - 1]
        threshold = jnp.maximum(jnp.float32(thresh), kth)
    else:
        threshold = jnp.float32(thresh)
    kept = prob_t <= threshold
    use_ohem = (num_valid > 0) & (num_valid >= min_kept)
    final = jnp.where(use_ohem, valid & kept, valid).astype(jnp.float32)
    return jnp.sum(ce * final) / jnp.sum(final)


def _criterion_ohem_ref(preds, target, *, aux_weight, thresh, min_kept, ignore_index):
    main_pred, aux_pred = preds
    l1 = _ohem_ce_loss_ref(main_pred, target, thresh=thresh, min_kept=min_kept,
                           ignore_index=ignore_index)
    l2 = _ohem_ce_loss_ref(aux_pred, target, thresh=thresh, min_kept=min_kept,
                           ignore_index=ignore_index)
    return l1 + aux_weight * l2


if __name__ == "__main__":
    key = jax.random.PRNGKey(0)
    k1, k2, k3, k4 = jax.random.split(key, 4)

    B, C, H, W = 2, 4, 32, 32
    IGNORE = 255
    AUX_WEIGHT = 0.4
    THRESH = 0.7
    MIN_KEPT = 64  # small enough that the OHEM branch actually triggers at this size

    main_pred = jax.random.normal(k1, (B, C, H, W), jnp.float32)
    aux_pred = jax.random.normal(k2, (B, C, H, W), jnp.float32)
    target = jax.random.randint(k3, (B, H, W), 0, C, jnp.int32)
    ignore_mask = jax.random.bernoulli(k4, 0.1, (B, H, W))
    target = jnp.where(ignore_mask, IGNORE, target)

    loss = criterion_ohem((main_pred, aux_pred), target,
                          aux_weight=AUX_WEIGHT, thresh=THRESH,
                          min_kept=MIN_KEPT, ignore_index=IGNORE)
    loss = jax.block_until_ready(loss)

    ref = _criterion_ohem_ref((main_pred, aux_pred), target,
                              aux_weight=AUX_WEIGHT, thresh=THRESH,
                              min_kept=MIN_KEPT, ignore_index=IGNORE)
    ref = jax.block_until_ready(ref)

    assert jnp.allclose(loss, ref, rtol=1e-3, atol=1e-5), (float(loss), float(ref))
    print("KERNEL_OK")
</pallas_src>

<mosaic_0001>
module attributes {stable_mosaic.version = 11 : i64} {
  func.func @_perpixel_kernel(%arg0: i32, %arg1: i32, %arg2: memref<1x4x8x128xf32, #tpu.memory_space<vmem>>, %arg3: memref<1x8x128xi32, #tpu.memory_space<vmem>>, %arg4: memref<1x8x128xf32, #tpu.memory_space<vmem>>, %arg5: memref<1x8x128xf32, #tpu.memory_space<vmem>>) attributes {dimension_semantics = [#tpu.dimension_semantics<parallel>, #tpu.dimension_semantics<parallel>], iteration_bounds = array<i64: 2, 1>, scalar_prefetch = 0 : i64, scratch_operands = 0 : i64, tpu.core_type = #tpu.core_type<tc>, window_params = [{transform_indices = @transform_0, window_bounds = array<i64: 1, 4, 8, 128>}, {transform_indices = @transform_1, window_bounds = array<i64: 1, 8, 128>}, {transform_indices = @transform_2, window_bounds = array<i64: 1, 8, 128>}, {transform_indices = @transform_3, window_bounds = array<i64: 1, 8, 128>}]} {
    %c0 = arith.constant 0 : index
    %c0_0 = arith.constant 0 : index
    %c0_1 = arith.constant 0 : index
    %c0_2 = arith.constant 0 : index
    %0 = vector.load %arg2[%c0, %c0_0, %c0_1, %c0_2] : memref<1x4x8x128xf32, #tpu.memory_space<vmem>>, vector<1x4x8x128xf32>
    %1 = vector.shape_cast %0 : vector<1x4x8x128xf32> to vector<4x8x128xf32>
    %c0_3 = arith.constant 0 : index
    %c0_4 = arith.constant 0 : index
    %c0_5 = arith.constant 0 : index
    %2 = vector.load %arg3[%c0_3, %c0_4, %c0_5] : memref<1x8x128xi32, #tpu.memory_space<vmem>>, vector<1x8x128xi32>
    %3 = vector.shape_cast %2 : vector<1x8x128xi32> to vector<8x128xi32>
    %c255_i32 = arith.constant 255 : i32
    %4 = vector.broadcast %c255_i32 : i32 to vector<8x128xi32>
    %5 = arith.cmpi ne, %3, %4 : vector<8x128xi32>
    %c0_i32 = arith.constant 0 : i32
    %6 = vector.broadcast %c0_i32 : i32 to vector<8x128xi32>
    %7 = arith.select %5, %3, %6 : vector<8x128xi1>, vector<8x128xi32>
    %8 = tpu.iota {dimensions = array<i32: 0>} : vector<4x8x128xi32>
    %9 = vector.shape_cast %7 : vector<8x128xi32> to vector<1x8x128xi32>
    %10 = vector.broadcast %9 : vector<1x8x128xi32> to vector<4x8x128xi32>
    %11 = arith.cmpi eq, %8, %10 : vector<4x8x128xi32>
    %12 = arith.extui %11 : vector<4x8x128xi1> to vector<4x8x128xi32>
    %13 = arith.sitofp %12 : vector<4x8x128xi32> to vector<4x8x128xf32>
    %cst = arith.constant dense<0xFF800000> : vector<8x128xf32>
    %14 = vector.multi_reduction <maximumf>, %1, %cst [0] : vector<4x8x128xf32> to vector<8x128xf32>
    %15 = vector.shape_cast %14 : vector<8x128xf32> to vector<1x8x128xf32>
    %16 = vector.broadcast %15 : vector<1x8x128xf32> to vector<4x8x128xf32>
    %17 = arith.subf %1, %16 : vector<4x8x128xf32>
    %18 = math.exp %17 : vector<4x8x128xf32>
    %cst_6 = arith.constant dense<0.000000e+00> : vector<8x128xf32>
    %19 = vector.multi_reduction <add>, %18, %cst_6 [0] : vector<4x8x128xf32> to vector<8x128xf32>
    %20 = math.log %19 : vector<8x128xf32>
    %21 = arith.mulf %17, %13 : vector<4x8x128xf32>
    %cst_7 = arith.constant dense<0.000000e+00> : vector<8x128xf32>
    %22 = vector.multi_reduction <add>, %21, %cst_7 [0] : vector<4x8x128xf32> to vector<8x128xf32>
    %23 = arith.subf %22, %20 : vector<8x128xf32>
    %cst_8 = arith.constant 0.000000e+00 : f32
    %24 = vector.broadcast %cst_8 : f32 to vector<8x128xf32>
    %25 = arith.subf %24, %23 : vector<8x128xf32>
    %c0_9 = arith.constant 0 : index
    %c0_10 = arith.constant 0 : index
    %c0_11 = arith.constant 0 : index
    %26 = vector.load %arg5[%c0_9, %c0_10, %c0_11] : memref<1x8x128xf32, #tpu.memory_space<vmem>>, vector<1x8x128xf32>
    %27 = vector.shape_cast %26 : vector<1x8x128xf32> to vector<8x128xf32>
    %28 = vector.shape_cast %25 : vector<8x128xf32> to vector<1x8x128xf32>
    tpu.vector_store %arg5[%c0_9, %c0_10, %c0_11], %28 {strides = array<i32>} : memref<1x8x128xf32, #tpu.memory_space<vmem>>, vector<1x8x128xf32>,
    %29 = math.exp %23 : vector<8x128xf32>
    %cst_12 = arith.constant 1.000000e+00 : f32
    %30 = vector.broadcast %cst_12 : f32 to vector<8x128xf32>
    %31 = arith.select %5, %29, %30 : vector<8x128xi1>, vector<8x128xf32>
    %c0_13 = arith.constant 0 : index
    %c0_14 = arith.constant 0 : index
    %c0_15 = arith.constant 0 : index
    %32 = vector.load %arg4[%c0_13, %c0_14, %c0_15] : memref<1x8x128xf32, #tpu.memory_space<vmem>>, vector<1x8x128xf32>
    %33 = vector.shape_cast %32 : vector<1x8x128xf32> to vector<8x128xf32>
    %34 = vector.shape_cast %31 : vector<8x128xf32> to vector<1x8x128xf32>
    tpu.vector_store %arg4[%c0_13, %c0_14, %c0_15], %34 {strides = array<i32>} : memref<1x8x128xf32, #tpu.memory_space<vmem>>, vector<1x8x128xf32>,
    return
  }
  func.func @transform_0(%arg0: i32, %arg1: i32) -> (i32, i32, i32, i32) {
    %c0_i32 = arith.constant 0 : i32
    %c0_i32_0 = arith.constant 0 : i32
    %c0_i32_1 = arith.constant 0 : i32
    return %arg0, %c0_i32, %arg1, %c0_i32_0 : i32, i32, i32, i32
  }
  func.func @transform_1(%arg0: i32, %arg1: i32) -> (i32, i32, i32) {
    %c0_i32 = arith.constant 0 : i32
    %c0_i32_0 = arith.constant 0 : i32
    return %arg0, %arg1, %c0_i32 : i32, i32, i32
  }
  func.func @transform_2(%arg0: i32, %arg1: i32) -> (i32, i32, i32) {
    %c0_i32 = arith.constant 0 : i32
    %c0_i32_0 = arith.constant 0 : i32
    return %arg0, %arg1, %c0_i32 : i32, i32, i32
  }
  func.func @transform_3(%arg0: i32, %arg1: i32) -> (i32, i32, i32) {
    %c0_i32 = arith.constant 0 : i32
    %c0_i32_0 = arith.constant 0 : i32
    return %arg0, %arg1, %c0_i32 : i32, i32, i32
  }
}

</mosaic_0001>

<bundles_post_ra>
// kernel: tpu_custom_call.1
= control target key start
LH: loop header
LB: loop body
LE: loop exit
PB: predicated region body
PF: predicated region fallthrough
CT: control target
= control target key end

     0   :  { %9 = vsyncpa [#allocation3], 0  ;;  %s1064_s0 = inlined_call_operand.hbm [shape: f32[2,4,8,128], index: 0, kind: input, shape index: {}]   ;;  %s1065_s1 = inlined_call_operand.hbm [shape: s32[2,8,128], index: 1, kind: input, shape index: {}]   ;;  %s1066_s2 = inlined_call_operand.hbm [shape: f32[2,8,128], index: 2, kind: output, shape index: {0}]   ;;  %s1067_s3 = inlined_call_operand.hbm [shape: f32[2,8,128], index: 3, kind: output, shape index: {1}]  }
   0x1   :  { %11 = vsyncpa [#allocation3 + $0x1], 0 }
   0x2   :  { %12 = vsyncpa [#allocation6], 0 }
   0x3   :  { %14 = vsyncpa [#allocation6 + $0x1], 0 }
   0x4   :  { %15 = vsyncpa [#allocation4], 0 }
   0x5   :  { %17 = vsyncpa [#allocation4 + $0x1], 0 }
   0x6   :  { %18 = vsyncpa [#allocation9], 0 }
   0x7   :  { %20 = vsyncpa [#allocation9 + $0x1], 0  ;;  %s803_s12 = smov 0   ;;  %s805_s13 = smov 0  }
   0x8   :  { %s807_s14 = smov 0   ;;  %s809_s15 = smov 0  }
   0x9   :  { %s811_s16 = smov 0   ;;  %s813_s17 = smov 0  }
   0xa LB: > { %s484_s18 = sadd.s32 4294967295, %s774_s17   ;;  %s485_s19 = sadd.s32 4294967294, %s774_s17   ;;  %s774_s17 = sphi %s813_s17, %s26_s17   ;;  %s770_s16 = sphi %s811_s16, %s1086_s16   ;;  %s766_s15 = sphi %s809_s15, %s1085_s15   ;;  %s762_s14 = sphi %s807_s14, %s1084_s14   ;;  %s758_s13 = sphi %s805_s13, %s1083_s13   ;;  %s754_s12 = sphi %s803_s12, %s1082_s12  }
   0xb   : > { %s38_s20 = sadd.s32 1, %s770_s16  ;;  %s47_s21 = sadd.s32 1, %s762_s14 }
   0xc   : > { %p40_p0 = scmp.ge.s32.totalorder %s38_s20, 2  ;;  %p54_p1 = scmp.ne.s32.totalorder %s762_s14, %s758_s13 }
   0xd   : > { %p55_p2 = scmp.eq.s32.totalorder %s774_s17, 0  ;;  %p60_p3 = scmp.ne.s32.totalorder %s758_s13, %s754_s12 }
   0xe   : > { %s1088_s20 = smov (%p40_p0, %s38_s20), 0  ;;  %p61_p5 = scmp.eq.s32.totalorder %s484_s18, 0 }
   0xf   : > { %p844_p4 = por %p55_p2, %p54_p1  ;;  %s42_s23 = ssub.s32 %s770_s16, %s1088_s20 }
  0x10   : > { %p114_p6 = scmp.eq.s32.totalorder %s484_s18, 1  ;;  %p45_p7 = scmp.eq.s32.totalorder %s42_s23, 0 }
  0x11   : > { %p850_p8 = por %p61_p5, %p60_p3  ;;  %p120_p10 = scmp.eq.s32.totalorder %s485_s19, 1 }
  0x12   : > { %p854_p9 = por %p114_p6, %p54_p1  ;;  %p531_p13 = scmp.lt.s32.totalorder %s774_s17, 2 }
  0x13   : > { %s1071_s24 = scalar_select %p850_p8, 1, 0 }
  0x14   : > { %s1072_s25 = scalar_select %p854_p9, 1, 0 }
  0x15   : > { %s859_s26 = scalar_select %p45_p7, %s762_s14, %s47_s21  }
  0x16   : > { %p861_p11 = por %p120_p10, %p60_p3  ;;  %s868_s28 = sand.u32 1, %s762_s14  }
  0x17   : > { %s488_s29 = sshll.u32 %s868_s28, 5  ;;  %s508_s30 = sshll.u32 %s770_s16, 9 }
  0x18   : > { %s1073_s27 = scalar_select %p861_p11, 1, 0 }
  0x19   : > { %s875_s6 = scalar_lea.hbm %s1064_s0, %s508_s30  ;;  %s172_s7 = scalar_lea.vmem [#allocation2], %s488_s29 }
  0x1a   : > { %s180_s8 = sshll.u32 %s172_s7, 4  ;;  %p881_p0 = pnand %p531_p13, %p844_p4  ;;  %s877_s8 = int_to_ptr.vmem [resolvable:$true] %s180_s8 }
  0x1b   : > { %s169_s10 = scalar_lea.sflag [#allocation3], %s868_s28  ;;  %s596_s11 = scalar_lea.hbm %s875_s6, 512 }
  0x1c   : > { %p597_p2 = scmp.ne.s32.totalorder %s875_s6, %s596_s11  ;;  %p598_p3 = pneg %p881_p0 }
  0x1d   : > { %s601_s21 = scalar_lea.hbm %s1064_s0, 1024  ;;  %p602_p4 = scmp.lt.u32.totalorder %s875_s6, %s1064_s0 }
  0x1e   : > { %p599_p5 = pnand %p598_p3, %p597_p2  ;;  %p603_p7 = scmp.lt.u32.totalorder %s601_s21, %s596_s11 }
  0x1f   : > { %p605_p13 = scmp.lt.u32.totalorder %s596_s11, %s875_s6 }
  0x20   : > { %p600_p6 = pneg %p599_p5  ;;  %p604_p10 = por %p603_p7, %p602_p4 }
  0x22   : > { %p606_p12 = por %p605_p13, %p604_p10 }
  0x24   : > { %p607_p1 = pnand %p606_p12, %p600_p6 }
  0x26   : > { %610 = shalt.err (!%p607_p1)
}
  0x27   : > { %s611_s29 = scalar_lea.vmem %s877_s8, 512  ;;  %s776_s30 = smov [#allocation2]  }
  0x28   : > { %p612_p2 = scmp.ne.s32.totalorder %s877_s8, %s611_s29  ;;  %s616_s4 = sshll.u32 %s776_s30, 4  ;;  %s617_s4 = int_to_ptr.vmem [resolvable:$false] %s616_s4 }
  0x29   : > { %s618_s5 = scalar_lea.vmem %s617_s4, 1024  ;;  %p619_p9 = scmp.lt.s32.totalorder %s877_s8, %s617_s4 }
  0x2a   : > { %p614_p5 = pnand %p612_p2, %p598_p3  ;;  %p620_p4 = scmp.lt.s32.totalorder %s618_s5, %s611_s29 }
  0x2c   : > { %p615_p11 = pneg %p614_p5  ;;  %p621_p7 = por %p620_p4, %p619_p9 }
  0x2e   : > { %p622_p10 = pnand %p621_p7, %p615_p11 }
  0x30   : > { %625 = shalt.err (!%p622_p10)
}
  0x31   : > { %s777_s7 = smov 128   ;;  %s778_s11 = smov 8  }
  0x32   : > { %520 = dma.hbm_to_vmem [thread:$0]  (!%p881_p0), %s875_s6, 512, %s877_s8, %s169_s10, %s777_s7, %s777_s7, %s778_s11  }
  0x33   : > { %p207_p12 = scmp.lt.s32.totalorder %s774_s17, 3  ;;  %s491_s18 = sshll.u32 %s868_s28, 3 }
  0x34   : > { %s492_s19 = sshll.u32 %s770_s16, 7  ;;  %p1075_p9 = scmp.ge.s32.totalorder %s774_s17, 1 }
  0x35   : > { %s926_s29 = scalar_lea.hbm %s1065_s1, %s492_s19  ;;  %s194_s30 = scalar_lea.vmem [#allocation5], %s491_s18 }
  0x36   : > { %p919_p11 = pnand %p1075_p9, %p207_p12  ;;  %s202_s4 = sshll.u32 %s194_s30, 4  ;;  %s203_s4 = int_to_ptr.vmem [resolvable:$true] %s202_s4 }
  0x37   : > { %s191_s6 = scalar_lea.sflag [#allocation6], %s868_s28  ;;  %s626_s8 = scalar_lea.hbm %s926_s29, 128 }
  0x38   : > { %s1076_s21 = scalar_select %p919_p11, 1, 0 }
  0x39   : > { %p627_p1 = scmp.ne.s32.totalorder %s926_s29, %s626_s8  ;;  %s631_s7 = scalar_lea.hbm %s1065_s1, 256 }
  0x3a   : > { %p632_p2 = scmp.lt.u32.totalorder %s926_s29, %s1065_s1  ;;  %p633_p5 = scmp.lt.u32.totalorder %s631_s7, %s626_s8 }
  0x3b   : > { %p629_p6 = pnand %p627_p1, %p598_p3  ;;  %p635_p7 = scmp.lt.u32.totalorder %s626_s8, %s926_s29 }
  0x3c   : > { %p634_p4 = por %p633_p5, %p632_p2 }
  0x3d   : > { %p630_p13 = pneg %p629_p6 }
  0x3e   : > { %p636_p10 = por %p635_p7, %p634_p4 }
  0x40   : > { %p637_p12 = pnand %p636_p10, %p630_p13 }
  0x42   : > { %640 = shalt.err (!%p637_p12)
}
  0x43   : > { %s641_s28 = scalar_lea.vmem %s203_s4, 128  ;;  %s779_s18 = smov [#allocation5]  }
  0x44   : > { %p642_p9 = scmp.ne.s32.totalorder %s203_s4, %s641_s28  ;;  %s646_s22 = sshll.u32 %s779_s18, 4  ;;  %s647_s22 = int_to_ptr.vmem [resolvable:$false] %s646_s22 }
  0x45   : > { %s648_s23 = scalar_lea.vmem %s647_s22, 256  ;;  %p649_p8 = scmp.lt.s32.totalorder %s203_s4, %s647_s22 }
  0x46   : > { %p644_p1 = pnand %p642_p9, %p598_p3  ;;  %p650_p11 = scmp.lt.s32.totalorder %s648_s23, %s641_s28 }
  0x48   : > { %p645_p6 = pneg %p644_p1  ;;  %p651_p2 = por %p650_p11, %p649_p8 }
  0x4a   : > { %p652_p5 = pnand %p651_p2, %p645_p6 }
  0x4c   : > { %655 = shalt.err (!%p652_p5)
}
  0x4d   : > { %523 = dma.hbm_to_vmem [thread:$0]  (!%p881_p0), %s926_s29, 128, %s203_s4, %s191_s6  }
  0x4e   : > { %p1077_p13 = scmp.ne.s32.totalorder %s1076_s21, 0 }
  0x4f   : > { %s951_s30 = sand.u32 (!%p1077_p13), 1, %s758_s13   ;;  %p1078_p3 = scmp.ne.s32.totalorder (!%p1077_p13), %s1071_s24, 0 }
  0x50   : > { %211 = sbr.rel (%p1077_p13) target bundleno = 174 (0xae), region = 28  ;;  %s494_s8 = sshll.u32 (!%p1077_p13), %s951_s30, 5 }
  0x51   : > { %s214_s10 = scalar_lea.sflag (!%p1077_p13), [#allocation3], %s951_s30  ;;  %s217_s5 = scalar_lea.vmem (!%p1077_p13), [#allocation2], %s494_s8 }
  0x57   : > { %737 = dma.done.wait (%p1078_p3), %s214_s10, 512  }
  0x58   : > { %739 = vsyncadd (%p1078_p3), %s214_s10, 4294966784  ;;  %s960_s9 = sshll.u32 %s951_s30, 3  ;;  %s223_s21 = scalar_lea.sflag [#allocation6], %s951_s30 }
  0x59   : > { %s226_s29 = scalar_lea.vmem [#allocation5], %s960_s9 }
  0x5a   : > { %741 = dma.done.wait (%p1078_p3), %s223_s21, 128  }
  0x5b   : > { %743 = vsyncadd (%p1078_p3), %s223_s21, 4294967168  ;;  %v259_v0 = vld [vmem:[%s217_s5] sm:$0xff]  ;;  %v260_v1 = vld [vmem:[%s217_s5 + $0x8] sm:$0xff]  ;;  %v780_v20 = vmov 0.0   ;;  %s258_s24 = scalar_lea.vmem [#allocation8], %s960_s9  ;;  %s504_s6 = sshll.u32 %s766_s15, 7 }
  0x5c   : > { %v261_v2 = vld [vmem:[%s217_s5 + $0x10] sm:$0xff]  ;;  %v262_v3 = vld [vmem:[%s217_s5 + $0x18] sm:$0xff]  ;;  %v278_v4 = vmax.f32 %v259_v0, %v260_v1  ;;  %v968_v15 = vld [vmem:[%s226_s29] sm:$0xff]  ;;  %s346_s4 = sshll.u32 %s258_s24, 4  ;;  %s983_s19 = scalar_lea.hbm %s1067_s3, %s504_s6  ;;  %s976_s4 = int_to_ptr.vmem [resolvable:$true] %s346_s4 }
  0x5d   : > { %v279_v5 = vmax.f32 %v261_v2, %v262_v3  ;;  %vm264_vm0 = vcmp.ne.s32.totalorder %v968_v15, 255  ;;  %s318_s28 = scalar_lea.sflag [#allocation9], %s951_s30  ;;  %s656_s18 = scalar_lea.vmem %s976_s4, 128 }
  0x5e   : > { %v265_v16 = vsel %vm264_vm0, %v968_v15, 0  ;;  %p657_p8 = scmp.ne.s32.totalorder %s976_s4, %s656_s18  ;;  %p1079_p0 = scmp.ne.s32.totalorder %s1072_s25, 0 }
  0x5f   : > { %v280_v6 = vmax.f32 %v278_v4, %v279_v5  ;;  %vm266_vm1 = vcmp.eq.s32.totalorder %v265_v16, 0  ;;  %vm267_vm2 = vcmp.eq.s32.totalorder %v265_v16, 1  ;;  %vm268_vm3 = vcmp.eq.s32.totalorder %v265_v16, 2  ;;  %s781_s22 = smov [#allocation8]  }
  0x60   : > { %v498_v21 = vsel %vm266_vm1, 1.0, %v780_v20  ;;  %v499_v22 = vsel %vm267_vm2, 1.0, %v780_v20  ;;  %v500_v28 = vsel %vm268_vm3, 1.0, %v780_v20  ;;  %vm269_vm4 = vcmp.eq.s32.totalorder %v265_v16, 3  ;;  %p658_p11 = pnand %p657_p8, %p1079_p0  ;;  %s660_s23 = sshll.u32 %s781_s22, 4  ;;  %s661_s23 = int_to_ptr.vmem [resolvable:$false] %s660_s23 }
  0x61   : > { %v281_v7 = vsub.f32 %v259_v0, %v280_v6  ;;  %v282_v8 = vsub.f32 %v260_v1, %v280_v6  ;;  %v283_v9 = vsub.f32 %v261_v2, %v280_v6  ;;  %v284_v10 = vsub.f32 %v262_v3, %v280_v6  ;;  %s662_s8 = scalar_lea.vmem %s661_s23, 256  ;;  %p663_p7 = scmp.lt.s32.totalorder %s976_s4, %s661_s23 }
  0x62   : > { %v501_v32 = vsel %vm269_vm4, 1.0, %v780_v20  ;;  %p659_p4 = pneg %p658_p11  ;;  %p664_p10 = scmp.lt.s32.totalorder %s662_s8, %s656_s18 }
  0x63   : > { %v285_v11 = vmul.f32 1.442695, %v281_v7  ;;  %v287_v12 = vmul.f32 1.442695, %v282_v8  ;;  %v289_v13 = vmul.f32 1.442695, %v283_v9  ;;  %v298_v26 = vmul.f32 %v498_v21, %v281_v7 }
  0x64   : > { %v291_v14 = vmul.f32 1.442695, %v284_v10  ;;  %v299_v27 = vmul.f32 %v499_v22, %v282_v8  ;;  %v300_v30 = vmul.f32 %v500_v28, %v283_v9  ;;  %v301_v33 = vmul.f32 %v501_v32, %v284_v10  ;;  %p665_p12 = por %p664_p10, %p663_p7 }
  0x65   : > { %584 = vpow2.f32 %v285_v11 }
  0x66   : > { %586 = vpow2.f32 %v287_v12  ;;  %v302_v31 = vadd.f32 %v299_v27, %v298_v26  ;;  %p666_p9 = pnand %p665_p12, %p659_p4 }
  0x67   : > { %588 = vpow2.f32 %v289_v13 }
  0x68   : > { %590 = vpow2.f32 %v291_v14  ;;  %v303_v34 = vadd.f32 %v302_v31, %v300_v30 }
  0x6a   : > { %v304_v35 = vadd.f32 %v303_v34, %v301_v33 }
  0x6f   : > { %v585_v17 = vpop.eup %584 }
  0x70   : > { %v587_v18 = vpop.eup %586 }
  0x71   : > { %v589_v19 = vpop.eup %588  ;;  %v293_v23 = vadd.f32 %v587_v18, %v585_v17 }
  0x72   : > { %v591_v24 = vpop.eup %590 }
  0x73   : > { %v294_v25 = vadd.f32 %v589_v19, %v293_v23 }
  0x75   : > { %v295_v29 = vadd.f32 %v591_v24, %v294_v25 }
  0x77   : > { %592 = vlog2.f32 %v295_v29 }
  0x81   : > { %v593_v36 = vpop.eup %592 }
  0x82   : > { %v297_v37 = vmul.f32 0.6931472, %v593_v36 }
  0x84   : > { %v305_v38 = vsub.f32 %v304_v35, %v297_v37 }
  0x86   : > { %v306_v39 = vsub.f32 0.0, %v305_v38  ;;  %v308_v40 = vmul.f32 1.442695, %v305_v38 }
  0x88   : > { %307 = vst [vmem:[%s258_s24] sm:$0xff] %v306_v39  ;;  %594 = vpow2.f32 %v308_v40 }
  0x89   : > { %669 = shalt.err (!%p666_p9)
}
  0x8a   : > { %s670_s10 = scalar_lea.hbm %s983_s19, 128  ;;  %s674_s29 = scalar_lea.hbm %s1067_s3, 256 }
  0x8b   : > { %p671_p1 = scmp.ne.s32.totalorder %s983_s19, %s670_s10  ;;  %p675_p5 = scmp.lt.u32.totalorder %s983_s19, %s1067_s3 }
  0x8c   : > { %p676_p13 = scmp.lt.u32.totalorder %s674_s29, %s670_s10  ;;  %p678_p8 = scmp.lt.u32.totalorder %s670_s10, %s983_s19 }
  0x8d   : > { %p672_p6 = pnand %p671_p1, %p1079_p0 }
  0x8e   : > { %p677_p3 = por %p676_p13, %p675_p5 }
  0x8f   : > { %p673_p2 = pneg %p672_p6 }
  0x90   : > { %p679_p11 = por %p678_p8, %p677_p3 }
  0x92   : > { %p680_p4 = pnand %p679_p11, %p673_p2 }
  0x94   : > { %683 = shalt.err (!%p680_p4)
}
  0x95   : > { %514 = dma.vmem_to_hbm [thread:$0]  (%p1079_p0), %s976_s4, 128, %s983_s19, %s318_s28   ;;  %v595_v41 = vpop.eup %594 }
  0x96   : > { %s251_s11 = scalar_lea.vmem [#allocation7], %s960_s9  ;;  %s1015_s8 = scalar_lea.hbm %s1066_s2, %s504_s6  ;;  %v310_v42 = vsel %vm264_vm0, %v595_v41, 1.0 }
  0x97   : > { %s332_s18 = sshll.u32 %s251_s11, 4  ;;  %311 = vst [vmem:[%s251_s11] sm:$0xff] %v310_v42  ;;  %s313_s10 = scalar_lea.sflag [#allocation4], %s951_s30  ;;  %s1008_s18 = int_to_ptr.vmem [resolvable:$true] %s332_s18 }
  0x98   : > { %s684_s4 = scalar_lea.vmem %s1008_s18, 128  ;;  %s782_s9 = smov [#allocation7]  }
  0x99   : > { %p685_p7 = scmp.ne.s32.totalorder %s1008_s18, %s684_s4  ;;  %s688_s19 = sshll.u32 %s782_s9, 4  ;;  %s689_s19 = int_to_ptr.vmem [resolvable:$false] %s688_s19 }
  0x9a   : > { %s690_s28 = scalar_lea.vmem %s689_s19, 256  ;;  %p691_p9 = scmp.lt.s32.totalorder %s1008_s18, %s689_s19 }
  0x9b   : > { %p686_p10 = pnand %p685_p7, %p1079_p0  ;;  %p692_p1 = scmp.lt.s32.totalorder %s690_s28, %s684_s4 }
  0x9d   : > { %p687_p12 = pneg %p686_p10  ;;  %p693_p6 = por %p692_p1, %p691_p9 }
  0x9f   : > { %p694_p2 = pnand %p693_p6, %p687_p12 }
  0xa1   : > { %697 = shalt.err (!%p694_p2)
}
  0xa2   : > { %s698_s15 = scalar_lea.hbm %s1015_s8, 128  ;;  %s702_s5 = scalar_lea.hbm %s1066_s2, 256 }
  0xa3   : > { %p699_p5 = scmp.ne.s32.totalorder %s1015_s8, %s698_s15  ;;  %p703_p8 = scmp.lt.u32.totalorder %s1015_s8, %s1066_s2 }
  0xa4   : > { %p704_p11 = scmp.lt.u32.totalorder %s702_s5, %s698_s15  ;;  %p706_p7 = scmp.lt.u32.totalorder %s698_s15, %s1015_s8 }
  0xa5   : > { %p700_p13 = pnand %p699_p5, %p1079_p0 }
  0xa6   : > { %p705_p4 = por %p704_p11, %p703_p8 }
  0xa7   : > { %p701_p3 = pneg %p700_p13 }
  0xa8   : > { %p707_p10 = por %p706_p7, %p705_p4 }
  0xaa   : > { %p708_p12 = pnand %p707_p10, %p701_p3 }
  0xac   : > { %711 = shalt.err (!%p708_p12)
}
  0xad   : > { %513 = dma.vmem_to_hbm [thread:$0]  (%p1079_p0), %s1008_s18, 128, %s1015_s8, %s313_s10  }
  0xae PF: > { %s358_s24 = sand.u32 1, %s754_s12   ;;  %p1080_p9 = scmp.ne.s32.totalorder %s1073_s27, 0 }
  0xaf   : > { %p1081_p1 = scmp.ge.s32.totalorder %s774_s17, 2  ;;  %s359_s7 = scalar_lea.sflag [#allocation4], %s358_s24 }
  0xb1   : > { %p525_p6 = pnand %p1081_p1, %p1080_p9 }
  0xb3   : > { %745 = dma.done.wait (!%p525_p6), %s359_s7, 128  }
  0xb4   : > { %747 = vsyncadd (!%p525_p6), %s359_s7, 4294967168  ;;  %s368_s11 = scalar_lea.sflag [#allocation9], %s358_s24 }
  0xb5   : > { %749 = dma.done.wait (!%p525_p6), %s368_s11, 128  }
  0xb6   : > { %751 = vsyncadd (!%p525_p6), %s368_s11, 4294967168  ;;  %s26_s17 = sadd.s32 1, %s774_s17   ;;  %s1082_s12 = smov %s758_s13 }
  0xb7   : > { %p23_p2 = scmp.ge.s32.totalorder %s26_s17, 4   ;;  %s1083_s13 = smov %s762_s14 }
  0xb8   : > { %s1084_s14 = smov %s859_s26  ;;  %s1085_s15 = smov %s770_s16 }
  0xb9   : > { %s1086_s16 = smov %s1088_s20  ;;  %25 = sbr.rel (!%p23_p2) target bundleno = 10 (0xa), region = 103 }
  0xc0   :  { %373 = vsyncpa [#allocation3], 1 }
  0xc1   :  { %375 = vsyncpa [#allocation3 + $0x1], 1 }
  0xc2   :  { %376 = vsyncpa [#allocation6], 1 }
  0xc3   :  { %378 = vsyncpa [#allocation6 + $0x1], 1 }
  0xc4   :  { %379 = vsyncpa [#allocation4], 1 }
  0xc5   :  { %381 = vsyncpa [#allocation4 + $0x1], 1 }
  0xc6   :  { %382 = vsyncpa [#allocation9], 1 }
  0xc7   :  { %384 = vsyncpa [#allocation9 + $0x1], 1 }

</bundles_post_ra>
